<compile_context>
chip_gen: v5e
topology: v5e:2x2
jax: 0.10.0
libtpu: 0.0.40
codegen_flags: <defaults>
</compile_context>

<pallas_src>
import jax
import jax.numpy as jnp
from jax.experimental import pallas as pl
from jax.experimental.pallas import tpu as pltpu

_W_CANDIDATES = (512, 256, 128)   # lane-dense slab widths (multiples of 128)
_TARGET_BLOCK_BYTES = 4 << 20     # ~4 MiB per input block per pipeline buffer
_MAX_CHUNK_ROWS = 256             # in-kernel accumulation chunk (rows)


def _cdiv(a, b):
    return -(-a // b)


def _round_up(a, b):
    return _cdiv(a, b) * b


def _sublane_multiple(dtype) -> int:
    # Minimum second-minor (sublane) block multiple for this dtype.
    return max(8, 32 // max(1, jnp.dtype(dtype).itemsize))


def _pick_tm(rows_needed, desired_rows, sub):
    """Block row count: multiple of `sub` and of its accumulation chunk."""
    tm = max(sub, min(desired_rows, _round_up(rows_needed, sub)))
    chunk = min(_MAX_CHUNK_ROWS, tm)
    tm = _round_up(tm, chunk)
    return tm, chunk


def _make_kernel(*, steps, tm, chunk, w, valid_rows, needs_mask):
    n_chunks = tm // chunk
    unroll = n_chunks <= 4

    def kernel(yhat_ref, y_ref, out_ref):
        # Zero the resident per-group accumulator on the group's first step.
        @pl.when(pl.program_id(1) == 0)
        def _():
            out_ref[...] = jnp.zeros_like(out_ref)

        block = pl.program_id(0) * steps + pl.program_id(1)
        row_base = block * tm

        def accumulate(masked):
            def body(c, acc):
                r0 = pl.multiple_of(c * chunk, chunk)
                d = (yhat_ref[pl.ds(r0, chunk), :].astype(jnp.float32)
                     - y_ref[pl.ds(r0, chunk), :].astype(jnp.float32))
                d2 = d * d
                if masked:
                    gid = (row_base + r0
                           + jax.lax.broadcasted_iota(jnp.int32, (chunk, 1), 0))
                    d2 = jnp.where(gid < valid_rows, d2, 0.0)
                # (chunk, W) -> (chunk//8, 8, W) keeps the (sublane, lane)
                # layout intact; the sum over axis 0 is pure VPU adds.
                return acc + d2.reshape(chunk // 8, 8, w).sum(axis=0)

            acc = jax.lax.fori_loop(0, n_chunks, body,
                                    jnp.zeros((8, w), jnp.float32),
                                    unroll=unroll)
            out_ref[...] += acc

        if not needs_mask:
            accumulate(masked=False)
        else:
            # Only the last real block can be partial; branch so full blocks
            # pay zero masking cost.
            is_full = row_base + tm <= valid_rows

            @pl.when(is_full)
            def _():
                accumulate(masked=False)

            @pl.when(jnp.logical_not(is_full))
            def _():
                accumulate(masked=True)

    return kernel


def rmse_loss(yhat: jax.Array, y: jax.Array, *,
              min_kernel_elems: int = 1 << 18) -> jax.Array:
    """sqrt(mean((yhat - y)^2)) over all elements, returned as an f32 scalar."""
    assert yhat.shape == y.shape, "yhat and y must have identical shapes"
    n = yhat.size

    # Small-input fast path: one fused XLA pass beats pallas_call fixed cost.
    if n == 0 or n < min_kernel_elems:
        d = yhat.astype(jnp.float32) - y.astype(jnp.float32)
        return jnp.sqrt(jnp.mean(d * d))

    yh = yhat.reshape(-1)
    yy = y.reshape(-1)

    # Widest lane-dense width dividing n -> the 2-D view is a free reshape
    # (no HBM copy).
    w = next((c for c in _W_CANDIDATES if n % c == 0), None)
    if w is None:
        # Rare: n not a multiple of 128.  Pad the tail (this is the only path
        # that copies the inputs; padded zeros contribute 0 to the sum).
        w = 128
        pad = _round_up(n, w) - n
        yh = jnp.pad(yh, (0, pad))
        yy = jnp.pad(yy, (0, pad))

    rows = yh.size // w
    yh = yh.reshape(rows, w)
    yy = yy.reshape(rows, w)

    itemsize_a = jnp.dtype(yhat.dtype).itemsize
    itemsize_b = jnp.dtype(y.dtype).itemsize
    sub = max(_sublane_multiple(yhat.dtype), _sublane_multiple(y.dtype))
    # Bytes-based block sizing: ~4 MiB for the widest input, so bf16 streams
    # 2x the rows of f32.
    desired = max(sub, (_TARGET_BLOCK_BYTES // (w * max(itemsize_a, itemsize_b)))
                  // sub * sub)

    # Two contiguous row groups so the "parallel" leading grid axis can shard
    # across both v7x TensorCores (harmless single-core on v5e/v6e).
    G = 2 if rows >= 2 * sub else 1
    tm, chunk = _pick_tm(_cdiv(rows, G), desired, sub)

    if G == 1 and rows < tm:
        # Tiny single-block input (< 2*sub rows): pad a handful of zero rows so
        # the lone block is well-formed.  Padded zeros contribute 0 to the sum.
        yh = jnp.pad(yh, ((0, tm - rows), (0, 0)))
        yy = jnp.pad(yy, ((0, tm - rows), (0, 0)))
        rows = tm

    nblocks = _cdiv(rows, tm)
    steps = _cdiv(nblocks, G)
    if G * steps != nblocks:
        # Odd block count: rebalance tm so the (G, steps) grid covers exactly
        # nblocks blocks (no redundant / zero-padded block DMA); otherwise fall
        # back to a single group.
        tm2, chunk2 = _pick_tm(_cdiv(rows, G * steps), desired, sub)
        nb2 = _cdiv(rows, tm2)
        st2 = _cdiv(nb2, G)
        if G * st2 == nb2:
            tm, chunk, nblocks, steps = tm2, chunk2, nb2, st2
        else:
            G, steps = 1, nblocks

    needs_mask = (rows % tm) != 0       # only the last block can be partial
    kernel = _make_kernel(steps=steps, tm=tm, chunk=chunk, w=w,
                          valid_rows=rows, needs_mask=needs_mask)

    in_map = lambda g, s: (g * steps + s, 0)     # contiguous blocks per group
    out_rows = 8 * G

    in_block_bytes = tm * w * (itemsize_a + itemsize_b)
    compiler_params = pltpu.CompilerParams(
        dimension_semantics=("parallel", "arbitrary"),
        # Double-buffered input blocks + resident output + chunk temporaries.
        vmem_limit_bytes=int(2 * in_block_bytes + (8 << 20)),
    )
    cost = pl.CostEstimate(
        flops=3 * n,                      # sub, mul, add per element
        transcendentals=0,
        bytes_accessed=int(n * (itemsize_a + itemsize_b) + out_rows * w * 4),
    )

    partials = pl.pallas_call(
        kernel,
        out_shape=jax.ShapeDtypeStruct((out_rows, w), jnp.float32),
        grid_spec=pltpu.PrefetchScalarGridSpec(
            num_scalar_prefetch=0,
            grid=(G, steps),
            in_specs=[pl.BlockSpec((tm, w), in_map),
                      pl.BlockSpec((tm, w), in_map)],
            out_specs=pl.BlockSpec((8, w), lambda g, s: (g, 0)),
        ),
        compiler_params=compiler_params,
        cost_estimate=cost,
    )(yh, yy)

    # Trivial epilogue: combine per-group/per-lane partials, mean over the true
    # element count, sqrt.
    return jnp.sqrt(jnp.sum(partials) / jnp.float32(n))


if __name__ == "__main__":
    key = jax.random.PRNGKey(0)
    k1, k2, k3, k4, k5, k6 = jax.random.split(key, 6)

    def ref_rmse(a, b):
        d = a.astype(jnp.float32) - b.astype(jnp.float32)
        return jnp.sqrt(jnp.mean(d * d))

    # 1) Module-consistent small NCHW input, forced through the Pallas kernel
    #    (tiny single-block path).
    yhat = jax.random.normal(k1, (2, 4, 16, 16), dtype=jnp.float32)
    y = jax.random.normal(k2, (2, 4, 16, 16), dtype=jnp.float32)
    out_small = jax.block_until_ready(rmse_loss(yhat, y, min_kernel_elems=0))
    ref_small = ref_rmse(yhat, y)
    assert jnp.allclose(out_small, ref_small, rtol=1e-5, atol=1e-6), (out_small, ref_small)

    # 2) bf16 inputs stream untouched (half the HBM read bytes); the f32 cast
    #    happens inside the kernel.
    yhat_bf, y_bf = yhat.astype(jnp.bfloat16), y.astype(jnp.bfloat16)
    out_bf = jax.block_until_ready(rmse_loss(yhat_bf, y_bf, min_kernel_elems=0))
    ref_bf = ref_rmse(yhat_bf, y_bf)
    assert jnp.allclose(out_bf, ref_bf, rtol=1e-5, atol=1e-6), (out_bf, ref_bf)

    # 3) Larger input exercising bytes-sized blocks, chunked accumulation and
    #    the two-group split (rows=2048 -> 2 groups x 1 block of 1024x512).
    yhat_l = jax.random.normal(k3, (8, 128, 32, 32), dtype=jnp.float32)
    y_l = jax.random.normal(k4, (8, 128, 32, 32), dtype=jnp.float32)
    out_l = jax.block_until_ready(rmse_loss(yhat_l, y_l))
    ref_l = ref_rmse(yhat_l, y_l)
    assert jnp.allclose(out_l, ref_l, rtol=1e-5, atol=1e-6), (out_l, ref_l)

    # 4) Row count not a multiple of the block rows (520 rows, tm=512): the
    #    tail block's invalid rows are masked in-kernel -- no jnp.pad full copy.
    yhat_r = jax.random.normal(k5, (520, 512), dtype=jnp.float32)
    y_r = jax.random.normal(k6, (520, 512), dtype=jnp.float32)
    out_r = jax.block_until_ready(rmse_loss(yhat_r, y_r, min_kernel_elems=0))
    ref_r = ref_rmse(yhat_r, y_r)
    assert jnp.allclose(out_r, ref_r, rtol=1e-5, atol=1e-6), (out_r, ref_r)

    # 5) Default small-input fast path (plain XLA, no kernel launch).
    out_fast = jax.block_until_ready(rmse_loss(yhat, y))
    assert jnp.allclose(out_fast, ref_small, rtol=1e-5, atol=1e-6), (out_fast, ref_small)

    print("KERNEL_OK")
</pallas_src>

<mosaic_0001>
module attributes {stable_mosaic.version = 11 : i64} {
  func.func @kernel(%arg0: i32, %arg1: i32, %arg2: memref<8x512xf32, #tpu.memory_space<vmem>>, %arg3: memref<8x512xf32, #tpu.memory_space<vmem>>, %arg4: memref<8x512xf32, #tpu.memory_space<vmem>>) attributes {dimension_semantics = [#tpu.dimension_semantics<parallel>, #tpu.dimension_semantics<arbitrary>], iteration_bounds = array<i64: 1, 1>, scalar_prefetch = 0 : i64, scratch_operands = 0 : i64, tpu.core_type = #tpu.core_type<tc>, window_params = [{transform_indices = @transform_0, window_bounds = array<i64: 8, 512>}, {transform_indices = @transform_1, window_bounds = array<i64: 8, 512>}, {transform_indices = @transform_2, window_bounds = array<i64: 8, 512>}]} {
    %c0_i32 = arith.constant 0 : i32
    %0 = arith.cmpi eq, %arg1, %c0_i32 : i32
    %1 = arith.extui %0 : i1 to i32
    %c0_i32_0 = arith.constant 0 : i32
    %2 = arith.cmpi ne, %1, %c0_i32_0 : i32
    scf.if %2 {
      %cst_8 = arith.constant 0.000000e+00 : f32
      %18 = vector.broadcast %cst_8 : f32 to vector<8x512xf32>
      %c0_9 = arith.constant 0 : index
      %c0_10 = arith.constant 0 : index
      %19 = vector.load %arg4[%c0_9, %c0_10] : memref<8x512xf32, #tpu.memory_space<vmem>>, vector<8x512xf32>
      tpu.vector_store %arg4[%c0_9, %c0_10], %18 {strides = array<i32>} : memref<8x512xf32, #tpu.memory_space<vmem>>, vector<8x512xf32>,
    } else {
    }
    %cst = arith.constant 0.000000e+00 : f32
    %3 = vector.broadcast %cst : f32 to vector<8x512xf32>
    %c0_i32_1 = arith.constant 0 : i32
    %c8_i32 = arith.constant 8 : i32
    %4 = arith.muli %c0_i32_1, %c8_i32 : i32
    %5 = tpu.assume_multiple %4, 8 : i32
    %6 = arith.index_cast %5 : i32 to index
    %c0 = arith.constant 0 : index
    %7 = vector.load %arg2[%6, %c0] : memref<8x512xf32, #tpu.memory_space<vmem>>, vector<8x512xf32>
    %8 = arith.index_cast %5 : i32 to index
    %c0_2 = arith.constant 0 : index
    %9 = vector.load %arg3[%8, %c0_2] : memref<8x512xf32, #tpu.memory_space<vmem>>, vector<8x512xf32>
    %10 = arith.subf %7, %9 : vector<8x512xf32>
    %11 = arith.mulf %10, %10 : vector<8x512xf32>
    %12 = vector.shape_cast %11 : vector<8x512xf32> to vector<1x8x512xf32>
    %cst_3 = arith.constant dense<0.000000e+00> : vector<8x512xf32>
    %13 = vector.multi_reduction <add>, %12, %cst_3 [0] : vector<1x8x512xf32> to vector<8x512xf32>
    %14 = arith.addf %3, %13 : vector<8x512xf32>
    %c1_i32 = arith.constant 1 : i32
    %c0_4 = arith.constant 0 : index
    %c0_5 = arith.constant 0 : index
    %15 = vector.load %arg4[%c0_4, %c0_5] : memref<8x512xf32, #tpu.memory_space<vmem>>, vector<8x512xf32>
    %16 = arith.addf %15, %14 : vector<8x512xf32>
    %c0_6 = arith.constant 0 : index
    %c0_7 = arith.constant 0 : index
    %17 = vector.load %arg4[%c0_6, %c0_7] : memref<8x512xf32, #tpu.memory_space<vmem>>, vector<8x512xf32>
    tpu.vector_store %arg4[%c0_6, %c0_7], %16 {strides = array<i32>} : memref<8x512xf32, #tpu.memory_space<vmem>>, vector<8x512xf32>,
    return
  }
  func.func @transform_0(%arg0: i32, %arg1: i32) -> (i32, i32) {
    %c1_i32 = arith.constant 1 : i32
    %0 = arith.muli %arg0, %c1_i32 : i32
    %1 = arith.addi %0, %arg1 : i32
    %c0_i32 = arith.constant 0 : i32
    %c0_i32_0 = arith.constant 0 : i32
    return %1, %c0_i32 : i32, i32
  }
  func.func @transform_1(%arg0: i32, %arg1: i32) -> (i32, i32) {
    %c1_i32 = arith.constant 1 : i32
    %0 = arith.muli %arg0, %c1_i32 : i32
    %1 = arith.addi %0, %arg1 : i32
    %c0_i32 = arith.constant 0 : i32
    %c0_i32_0 = arith.constant 0 : i32
    return %1, %c0_i32 : i32, i32
  }
  func.func @transform_2(%arg0: i32, %arg1: i32) -> (i32, i32) {
    %c0_i32 = arith.constant 0 : i32
    %c0_i32_0 = arith.constant 0 : i32
    return %arg0, %c0_i32 : i32, i32
  }
}

</mosaic_0001>

<bundles_post_ra>
// kernel: tpu_custom_call.1
= control target key start
LH: loop header
LB: loop body
LE: loop exit
PB: predicated region body
PF: predicated region fallthrough
CT: control target
= control target key end

     0   :  { %7 = vsyncpa [#allocation3], 0  ;;  %s226_s0 = inlined_call_operand.hbm [shape: f32[8,512], index: 0, kind: input, shape index: {}]   ;;  %s227_s1 = inlined_call_operand.hbm [shape: f32[8,512], index: 1, kind: input, shape index: {}]   ;;  %s228_s2 = inlined_call_operand.hbm [shape: f32[8,512], index: 2, kind: output, shape index: {}]  }
   0x1   :  { %8 = vsyncpa [#allocation6], 0 }
   0x2   :  { %9 = vsyncpa [#allocation4], 0  ;;  %s19_s11 = sshll.u32 %s226_s0, 4  ;;  %s199_s12 = smov [#allocation2]   ;;  %s20_s11 = int_to_ptr.hbm [resolvable:$true] %s19_s11 }
   0x3   :  { %s21_s13 = sshll.u32 %s199_s12, 4  ;;  %s34_s16 = sshll.u32 %s227_s1, 4  ;;  %s22_s13 = int_to_ptr.vmem [resolvable:$true] %s21_s13  ;;  %s35_s16 = int_to_ptr.hbm [resolvable:$true] %s34_s16 }
   0x4   :  { %24 = dma.hbm_to_vmem [thread:$0]  %s20_s11, 512, %s22_s13, [#allocation3]  }
   0x5   :  { %s200_s17 = smov [#allocation5]  }
   0x6   :  { %s36_s18 = sshll.u32 %s200_s17, 4  ;;  %s37_s18 = int_to_ptr.vmem [resolvable:$true] %s36_s18 }
   0x7   :  { %39 = dma.hbm_to_vmem [thread:$0]  %s35_s16, 512, %s37_s18, [#allocation6]  }
   0x8   :  { %193 = dma.done.wait [#allocation3], 512  }
   0x9   :  { %194 = vsyncadd [#allocation3], 4294966784 }
   0xa   :  { %195 = dma.done.wait [#allocation6], 512  }
   0xb   :  { %196 = vsyncadd [#allocation6], 4294966784  ;;  %v61_v0 = vld [vmem:[#allocation2] sm:$0xff]  ;;  %v62_v2 = vld [vmem:[#allocation2 + $0x8] sm:$0xff]  ;;  %s201_s0 = smov [#allocation7]   ;;  %s106_s21 = sshll.u32 %s228_s2, 4  ;;  %s107_s21 = int_to_ptr.hbm [resolvable:$true] %s106_s21 }
   0xc   :  { %v67_v1 = vld [vmem:[#allocation5] sm:$0xff]  ;;  %v68_v4 = vld [vmem:[#allocation5 + $0x8] sm:$0xff]  ;;  %v63_v5 = vld [vmem:[#allocation2 + $0x10] sm:$0xff]  ;;  %s104_s1 = sshll.u32 %s201_s0, 4  ;;  %s105_s1 = int_to_ptr.vmem [resolvable:$true] %s104_s1 }
   0xd   :  { %v71_v3 = vsub.f32 %v61_v0, %v67_v1  ;;  %v69_v6 = vld [vmem:[#allocation5 + $0x10] sm:$0xff]  ;;  %v72_v7 = vsub.f32 %v62_v2, %v68_v4  ;;  %v64_v9 = vld [vmem:[#allocation2 + $0x18] sm:$0xff] }
   0xe   :  { %v73_v8 = vsub.f32 %v63_v5, %v69_v6  ;;  %v70_v10 = vld [vmem:[#allocation5 + $0x18] sm:$0xff] }
   0xf   :  { %v75_v11 = vmul.f32 %v71_v3, %v71_v3  ;;  %v74_v12 = vsub.f32 %v64_v9, %v70_v10  ;;  %v76_v13 = vmul.f32 %v72_v7, %v72_v7 }
  0x10   :  { %v77_v14 = vmul.f32 %v73_v8, %v73_v8 }
  0x11   :  { %v78_v15 = vmul.f32 %v74_v12, %v74_v12  ;;  %95 = vst [vmem:[#allocation7] sm:$0xff] %v75_v11 }
  0x12   :  { %96 = vst [vmem:[#allocation7 + $0x8] sm:$0xff] %v76_v13 }
  0x13   :  { %97 = vst [vmem:[#allocation7 + $0x10] sm:$0xff] %v77_v14 }
  0x14   :  { %98 = vst [vmem:[#allocation7 + $0x18] sm:$0xff] %v78_v15 }
  0x15   :  { %109 = dma.vmem_to_hbm [thread:$0]  %s105_s1, 512, %s107_s21, [#allocation4]  }
  0x16   :  { %197 = dma.done.wait [#allocation4], 512  }
  0x17   :  { %198 = vsyncadd [#allocation4], 4294966784 }
  0x18   :  { %114 = vsyncpa [#allocation3], 1 }
  0x19   :  { %115 = vsyncpa [#allocation6], 1 }
  0x1a   :  { %116 = vsyncpa [#allocation4], 1 }

</bundles_post_ra>
